<compile_context>
chip_gen: v7x
topology: tpu7x:2x2x1
jax: 0.10.0
libtpu: 0.0.40
codegen_flags: <defaults>
</compile_context>

<pallas_src>
import math
import numpy as np
import jax
import jax.numpy as jnp
from jax import lax
from jax.experimental import pallas as pl
from jax.experimental.pallas import tpu as pltpu


def _adaptive_pool_matrix(h, w, ds):
    """Build P of shape [h*w, ds*ds] so that (x[t, h*w] @ P) equals
    AdaptiveAvgPool2d((ds, ds)) applied to x[t, h, w] (PyTorch bin rule)."""
    P = np.zeros((h * w, ds * ds), dtype=np.float32)
    for oi in range(ds):
        i0 = (oi * h) // ds
        i1 = -(-((oi + 1) * h) // ds)  # ceil
        for oj in range(ds):
            j0 = (oj * w) // ds
            j1 = -(-((oj + 1) * w) // ds)
            cnt = (i1 - i0) * (j1 - j0)
            for i in range(i0, i1):
                for j in range(j0, j1):
                    P[i * w + j, oi * ds + oj] = 1.0 / cnt
    return jnp.asarray(P)


def _cta_kernel(v_ref, p_ref, wq_ref, bq_ref, wk_ref, bk_ref, o_ref):
    # v_ref block: [1, t, ct, hw] — one batch element, C_TILE channels,
    # already in the module's native (and final) layout.
    _, t, ct, hw = v_ref.shape
    tct = t * ct

    # Flatten (t, ct) -> rows; row r corresponds to (time = r // ct, chan = r % ct).
    v2 = v_ref[0].reshape(tct, hw)                                # [tct, hw] f32

    # AdaptiveAvgPool3d((None, ds, ds)) as a matmul, then fc_q / fc_k.
    pooled = jnp.dot(v2, p_ref[...], preferred_element_type=jnp.float32)
    q = jnp.dot(pooled, wq_ref[...],
                preferred_element_type=jnp.float32) + bq_ref[...]   # scale folded
    k = jnp.dot(pooled, wk_ref[...],
                preferred_element_type=jnp.float32) + bk_ref[...]

    # Full gram over the flattened row axis (NT matmul, no transposes), then
    # mask cross-channel entries so the row softmax equals the per-channel
    # softmax of the reference.
    s = lax.dot_general(q, k, (((1,), (1,)), ((), ())),
                        preferred_element_type=jnp.float32)        # [tct, tct]
    row_c = lax.broadcasted_iota(jnp.int32, (tct, tct), 0) % ct
    col_c = lax.broadcasted_iota(jnp.int32, (tct, tct), 1) % ct
    s = jnp.where(row_c == col_c, s, jnp.float32(-1e30))

    # Numerically-stable softmax over the key axis; masked entries underflow
    # to exactly 0.  Denominator via the EUP approximate reciprocal.
    s = s - jnp.max(s, axis=-1, keepdims=True)
    e = jnp.exp(s)
    att = e * pl.reciprocal(jnp.sum(e, axis=-1, keepdims=True), approx=True)
    # dropout: eval-mode identity.

    # Block-diagonal attention applied to v gives the output directly in the
    # native [t, ct, hw] layout.
    out = jnp.dot(att, v2, preferred_element_type=jnp.float32)     # [tct, hw]
    o_ref[0] = out.reshape(t, ct, hw).astype(o_ref.dtype)


def _pick_c_tile(c, t, hw, itemsize, budget_bytes=12 << 20, max_tct=256):
    """Largest channel tile such that
       - it divides c,
       - it equals c or is a multiple of 8 (BlockSpec (8,128) rule, 2nd-minor dim),
       - t*ct <= max_tct (keeps the masked-attention flop overhead well under
         the HBM-bound per-step DMA time on v5e/v6e/v7x),
       - ~6x block bytes (double-buffered in/out + in-kernel copies) plus the
         [tct, tct] attention temporaries fit the default scoped-VMEM limit."""
    candidates = [ct for ct in range(1, c + 1)
                  if c % ct == 0 and (ct == c or ct % 8 == 0)]

    def fits(ct):
        block = t * ct * hw * itemsize
        att_tmp = 3 * (t * ct) * (t * ct) * 4
        return (t * ct <= max_tct) and (6 * block + att_tmp <= budget_bytes)

    feasible = [ct for ct in candidates if fits(ct)]
    return max(feasible) if feasible else min(candidates)


def channel_time_attention(x, wq, bq, wk, bk, d_scaled, c_tile=None):
    """x: [b, t, c, h, w] float32. Returns [b, t, c, h, w]."""
    b, t, c, h, w = x.shape
    hw = h * w
    d_out = wq.shape[0]          # d_t * 2
    ds2 = d_scaled * d_scaled

    # Native layout [b, t, c, hw]: contiguous reshape — no transpose, no copy.
    v = x.reshape(b, t, c, hw)

    P = _adaptive_pool_matrix(h, w, d_scaled)                  # [hw, ds2]
    inv_sqrt_t = jnp.float32(1.0 / math.sqrt(t))
    # Fold the 1/sqrt(t) attention scale into the q weight/bias (weight
    # constant-folding, not activation pre-scaling).
    wq_s = wq.T * inv_sqrt_t                                   # [ds2, d_out]
    bq_s = (bq * inv_sqrt_t).reshape(1, d_out)
    wk_t = wk.T                                                # [ds2, d_out]
    bk_r = bk.reshape(1, d_out)

    if c_tile is None:
        c_tile = _pick_c_tile(c, t, hw, x.dtype.itemsize)
    assert c % c_tile == 0, (c, c_tile)

    grid = (b, c // c_tile)
    out = pl.pallas_call(
        _cta_kernel,
        out_shape=jax.ShapeDtypeStruct((b, t, c, hw), x.dtype),
        grid_spec=pltpu.PrefetchScalarGridSpec(
            num_scalar_prefetch=0,
            grid=grid,
            in_specs=[
                pl.BlockSpec((1, t, c_tile, hw), lambda i, j: (i, 0, j, 0)),
                pl.BlockSpec((hw, ds2), lambda i, j: (0, 0)),
                pl.BlockSpec((ds2, d_out), lambda i, j: (0, 0)),
                pl.BlockSpec((1, d_out), lambda i, j: (0, 0)),
                pl.BlockSpec((ds2, d_out), lambda i, j: (0, 0)),
                pl.BlockSpec((1, d_out), lambda i, j: (0, 0)),
            ],
            out_specs=pl.BlockSpec((1, t, c_tile, hw),
                                   lambda i, j: (i, 0, j, 0)),
        ),
        compiler_params=pltpu.CompilerParams(
            dimension_semantics=("parallel", "parallel"),
            vmem_limit_bytes=32 << 20),
    )(v, P, wq_s, bq_s, wk_t, bk_r)

    # Output is already [b, t, c, hw] == final layout; only reshape remains.
    return out.reshape(b, t, c, h, w)


def _reference(x, wq, bq, wk, bk, d_scaled):
    """Pure-JAX reference matching the PyTorch forward (eval mode)."""
    b, t, c, h, w = x.shape
    shift = jnp.transpose(x, (0, 2, 1, 3, 4))                  # [b, c, t, h, w]
    P = _adaptive_pool_matrix(h, w, d_scaled)
    v = shift.reshape(b * c, t, h * w)
    pooled = v @ P                                             # [b*c, t, ds2]
    q = pooled @ wq.T + bq
    k = pooled @ wk.T + bk
    att = jnp.einsum("bij,bkj->bik", q, k) / np.sqrt(t)
    att = jax.nn.softmax(att, axis=-1)
    out = att @ v
    return jnp.transpose(out.reshape(b, c, t, h, w), (0, 2, 1, 3, 4))


if __name__ == "__main__":
    # Small shapes consistent with the module: x = [b, t, c, h, w]
    b, t, c, h, w = 2, 8, 4, 16, 16
    d_t = t
    d_scaled = 4
    ds2 = d_scaled * d_scaled

    key = jax.random.PRNGKey(0)
    kx, kwq, kbq, kwk, kbk = jax.random.split(key, 5)

    x = jax.random.normal(kx, (b, t, c, h, w), dtype=jnp.float32)
    # Synthetic parameters with std=0.5 (instead of the module's 0.001 init)
    # so the softmax is meaningfully non-uniform and the test actually
    # exercises the q/k/scale/softmax path.
    wq = 0.5 * jax.random.normal(kwq, (d_t * 2, ds2), dtype=jnp.float32)
    bq = 0.5 * jax.random.normal(kbq, (d_t * 2,), dtype=jnp.float32)
    wk = 0.5 * jax.random.normal(kwk, (d_t * 2, ds2), dtype=jnp.float32)
    bk = 0.5 * jax.random.normal(kbk, (d_t * 2,), dtype=jnp.float32)

    out = channel_time_attention(x, wq, bq, wk, bk, d_scaled)
    out = jax.block_until_ready(out)

    ref = _reference(x, wq, bq, wk, bk, d_scaled)
    # Tolerance covers the EUP approximate reciprocal in the softmax
    # denominator; everything else in the kernel is exact f32, and any
    # structural/layout/mask bug would produce O(0.1+) errors.
    np.testing.assert_allclose(np.asarray(out), np.asarray(ref),
                               rtol=1e-2, atol=1e-3)
    print("KERNEL_OK")
</pallas_src>

<mosaic_0001>
module attributes {stable_mosaic.version = 11 : i64} {
  func.func @_cta_kernel(%arg0: i32, %arg1: i32, %arg2: memref<1x8x4x256xf32, #tpu.memory_space<vmem>>, %arg3: memref<256x16xf32, #tpu.memory_space<vmem>>, %arg4: memref<16x16xf32, #tpu.memory_space<vmem>>, %arg5: memref<1x16xf32, #tpu.memory_space<vmem>>, %arg6: memref<16x16xf32, #tpu.memory_space<vmem>>, %arg7: memref<1x16xf32, #tpu.memory_space<vmem>>, %arg8: memref<1x8x4x256xf32, #tpu.memory_space<vmem>>) attributes {dimension_semantics = [#tpu.dimension_semantics<parallel>, #tpu.dimension_semantics<parallel>], iteration_bounds = array<i64: 2, 1>, scalar_prefetch = 0 : i64, scratch_operands = 0 : i64, tpu.core_type = #tpu.core_type<tc>, window_params = [{transform_indices = @transform_0, window_bounds = array<i64: 1, 8, 4, 256>}, {pipeline_mode = #tpu.pipeline_mode<synchronous>, transform_indices = @transform_1, window_bounds = array<i64: 256, 16>}, {pipeline_mode = #tpu.pipeline_mode<synchronous>, transform_indices = @transform_2, window_bounds = array<i64: 16, 16>}, {pipeline_mode = #tpu.pipeline_mode<synchronous>, transform_indices = @transform_3, window_bounds = array<i64: 1, 16>}, {pipeline_mode = #tpu.pipeline_mode<synchronous>, transform_indices = @transform_4, window_bounds = array<i64: 16, 16>}, {pipeline_mode = #tpu.pipeline_mode<synchronous>, transform_indices = @transform_5, window_bounds = array<i64: 1, 16>}, {transform_indices = @transform_6, window_bounds = array<i64: 1, 8, 4, 256>}]} {
    %c0 = arith.constant 0 : index
    %c0_0 = arith.constant 0 : index
    %c0_1 = arith.constant 0 : index
    %c0_2 = arith.constant 0 : index
    %0 = vector.load %arg2[%c0, %c0_0, %c0_1, %c0_2] : memref<1x8x4x256xf32, #tpu.memory_space<vmem>>, vector<1x8x4x256xf32>
    %1 = vector.shape_cast %0 : vector<1x8x4x256xf32> to vector<8x4x256xf32>
    %2 = vector.shape_cast %1 : vector<8x4x256xf32> to vector<32x256xf32>
    %c0_3 = arith.constant 0 : index
    %c0_4 = arith.constant 0 : index
    %3 = vector.load %arg3[%c0_3, %c0_4] : memref<256x16xf32, #tpu.memory_space<vmem>>, vector<256x16xf32>
    %cst = arith.constant dense<0.000000e+00> : vector<32x16xf32>
    %4 = tpu.matmul %2, %3, %cst {dimension_numbers = #tpu.dot_dimension_numbers<[1], [0], [0], [1], [0, 0, 1, 1], [], []>} : vector<32x256xf32>, vector<256x16xf32>, vector<32x16xf32> -> vector<32x16xf32>
    %c0_5 = arith.constant 0 : index
    %c0_6 = arith.constant 0 : index
    %5 = vector.load %arg4[%c0_5, %c0_6] : memref<16x16xf32, #tpu.memory_space<vmem>>, vector<16x16xf32>
    %cst_7 = arith.constant dense<0.000000e+00> : vector<32x16xf32>
    %6 = tpu.matmul %4, %5, %cst_7 {dimension_numbers = #tpu.dot_dimension_numbers<[1], [0], [0], [1], [0, 0, 1, 1], [], []>} : vector<32x16xf32>, vector<16x16xf32>, vector<32x16xf32> -> vector<32x16xf32>
    %c0_8 = arith.constant 0 : index
    %c0_9 = arith.constant 0 : index
    %7 = vector.load %arg5[%c0_8, %c0_9] : memref<1x16xf32, #tpu.memory_space<vmem>>, vector<1x16xf32>
    %8 = vector.broadcast %7 : vector<1x16xf32> to vector<32x16xf32>
    %9 = arith.addf %6, %8 : vector<32x16xf32>
    %c0_10 = arith.constant 0 : index
    %c0_11 = arith.constant 0 : index
    %10 = vector.load %arg6[%c0_10, %c0_11] : memref<16x16xf32, #tpu.memory_space<vmem>>, vector<16x16xf32>
    %cst_12 = arith.constant dense<0.000000e+00> : vector<32x16xf32>
    %11 = tpu.matmul %4, %10, %cst_12 {dimension_numbers = #tpu.dot_dimension_numbers<[1], [0], [0], [1], [0, 0, 1, 1], [], []>} : vector<32x16xf32>, vector<16x16xf32>, vector<32x16xf32> -> vector<32x16xf32>
    %c0_13 = arith.constant 0 : index
    %c0_14 = arith.constant 0 : index
    %12 = vector.load %arg7[%c0_13, %c0_14] : memref<1x16xf32, #tpu.memory_space<vmem>>, vector<1x16xf32>
    %13 = vector.broadcast %12 : vector<1x16xf32> to vector<32x16xf32>
    %14 = arith.addf %11, %13 : vector<32x16xf32>
    %cst_15 = arith.constant dense<0.000000e+00> : vector<32x32xf32>
    %15 = tpu.matmul %9, %14, %cst_15 {dimension_numbers = #tpu.dot_dimension_numbers<[1], [1], [0], [0], [0, 0, 1, 0], [], []>} : vector<32x16xf32>, vector<32x16xf32>, vector<32x32xf32> -> vector<32x32xf32>
    %16 = tpu.iota {dimensions = array<i32: 0>} : vector<32x32xi32>
    %c4_i32 = arith.constant 4 : i32
    %c0_i32 = arith.constant 0 : i32
    %17 = arith.cmpi eq, %c4_i32, %c0_i32 : i32
    %c1_i32 = arith.constant 1 : i32
    %18 = arith.select %17, %c1_i32, %c4_i32 : i32
    %19 = vector.broadcast %18 : i32 to vector<32x32xi32>
    %20 = arith.remsi %16, %19 : vector<32x32xi32>
    %c0_i32_16 = arith.constant 0 : i32
    %21 = vector.broadcast %c0_i32_16 : i32 to vector<32x32xi32>
    %22 = arith.cmpi ne, %20, %21 : vector<32x32xi32>
    %c0_i32_17 = arith.constant 0 : i32
    %23 = vector.broadcast %c0_i32_17 : i32 to vector<32x32xi32>
    %24 = arith.cmpi slt, %20, %23 : vector<32x32xi32>
    %c0_i32_18 = arith.constant 0 : i32
    %25 = arith.cmpi slt, %18, %c0_i32_18 : i32
    %26 = vector.broadcast %25 : i1 to vector<32x32xi1>
    %27 = vector.broadcast %26 : vector<32x32xi1> to vector<32x32xi1>
    %28 = arith.xori %24, %27 : vector<32x32xi1>
    %29 = arith.andi %28, %22 : vector<32x32xi1>
    %30 = vector.broadcast %18 : i32 to vector<32x32xi32>
    %31 = arith.addi %20, %30 : vector<32x32xi32>
    %32 = arith.select %29, %31, %20 : vector<32x32xi1>, vector<32x32xi32>
    %33 = tpu.iota {dimensions = array<i32: 1>} : vector<32x32xi32>
    %c4_i32_19 = arith.constant 4 : i32
    %c0_i32_20 = arith.constant 0 : i32
    %34 = arith.cmpi eq, %c4_i32_19, %c0_i32_20 : i32
    %c1_i32_21 = arith.constant 1 : i32
    %35 = arith.select %34, %c1_i32_21, %c4_i32_19 : i32
    %36 = vector.broadcast %35 : i32 to vector<32x32xi32>
    %37 = arith.remsi %33, %36 : vector<32x32xi32>
    %c0_i32_22 = arith.constant 0 : i32
    %38 = vector.broadcast %c0_i32_22 : i32 to vector<32x32xi32>
    %39 = arith.cmpi ne, %37, %38 : vector<32x32xi32>
    %c0_i32_23 = arith.constant 0 : i32
    %40 = vector.broadcast %c0_i32_23 : i32 to vector<32x32xi32>
    %41 = arith.cmpi slt, %37, %40 : vector<32x32xi32>
    %c0_i32_24 = arith.constant 0 : i32
    %42 = arith.cmpi slt, %35, %c0_i32_24 : i32
    %43 = vector.broadcast %42 : i1 to vector<32x32xi1>
    %44 = vector.broadcast %43 : vector<32x32xi1> to vector<32x32xi1>
    %45 = arith.xori %41, %44 : vector<32x32xi1>
    %46 = arith.andi %45, %39 : vector<32x32xi1>
    %47 = vector.broadcast %35 : i32 to vector<32x32xi32>
    %48 = arith.addi %37, %47 : vector<32x32xi32>
    %49 = arith.select %46, %48, %37 : vector<32x32xi1>, vector<32x32xi32>
    %50 = arith.cmpi eq, %32, %49 : vector<32x32xi32>
    %cst_25 = arith.constant -1.000000e+30 : f32
    %51 = vector.broadcast %cst_25 : f32 to vector<32x32xf32>
    %52 = arith.select %50, %15, %51 : vector<32x32xi1>, vector<32x32xf32>
    %cst_26 = arith.constant dense<0xFF800000> : vector<32xf32>
    %53 = vector.multi_reduction <maximumf>, %52, %cst_26 [1] : vector<32x32xf32> to vector<32xf32>
    %54 = vector.shape_cast %53 : vector<32xf32> to vector<32x1xf32>
    %55 = vector.broadcast %54 : vector<32x1xf32> to vector<32x32xf32>
    %56 = arith.subf %52, %55 : vector<32x32xf32>
    %57 = math.exp %56 : vector<32x32xf32>
    %cst_27 = arith.constant dense<0.000000e+00> : vector<32xf32>
    %58 = vector.multi_reduction <add>, %57, %cst_27 [1] : vector<32x32xf32> to vector<32xf32>
    %59 = vector.shape_cast %58 : vector<32xf32> to vector<32x1xf32>
    %60 = tpu.reciprocal %59 {approx = true} : vector<32x1xf32> -> vector<32x1xf32>
    %61 = vector.broadcast %60 : vector<32x1xf32> to vector<32x32xf32>
    %62 = arith.mulf %57, %61 : vector<32x32xf32>
    %cst_28 = arith.constant dense<0.000000e+00> : vector<32x256xf32>
    %63 = tpu.matmul %62, %2, %cst_28 {dimension_numbers = #tpu.dot_dimension_numbers<[1], [0], [0], [1], [0, 0, 1, 1], [], []>} : vector<32x32xf32>, vector<32x256xf32>, vector<32x256xf32> -> vector<32x256xf32>
    %64 = vector.shape_cast %63 : vector<32x256xf32> to vector<8x4x256xf32>
    %c0_29 = arith.constant 0 : index
    %c0_30 = arith.constant 0 : index
    %c0_31 = arith.constant 0 : index
    %c0_32 = arith.constant 0 : index
    %65 = vector.load %arg8[%c0_29, %c0_30, %c0_31, %c0_32] : memref<1x8x4x256xf32, #tpu.memory_space<vmem>>, vector<1x8x4x256xf32>
    %66 = vector.shape_cast %65 : vector<1x8x4x256xf32> to vector<8x4x256xf32>
    %67 = vector.shape_cast %64 : vector<8x4x256xf32> to vector<1x8x4x256xf32>
    tpu.vector_store %arg8[%c0_29, %c0_30, %c0_31, %c0_32], %67 {strides = array<i32>} : memref<1x8x4x256xf32, #tpu.memory_space<vmem>>, vector<1x8x4x256xf32>,
    return
  }
  func.func @transform_0(%arg0: i32, %arg1: i32) -> (i32, i32, i32, i32) {
    %c0_i32 = arith.constant 0 : i32
    %c0_i32_0 = arith.constant 0 : i32
    %c0_i32_1 = arith.constant 0 : i32
    return %arg0, %c0_i32, %arg1, %c0_i32_0 : i32, i32, i32, i32
  }
  func.func @transform_1(%arg0: i32, %arg1: i32) -> (i32, i32) {
    %c0_i32 = arith.constant 0 : i32
    %c0_i32_0 = arith.constant 0 : i32
    %c0_i32_1 = arith.constant 0 : i32
    return %c0_i32, %c0_i32_0 : i32, i32
  }
  func.func @transform_2(%arg0: i32, %arg1: i32) -> (i32, i32) {
    %c0_i32 = arith.constant 0 : i32
    %c0_i32_0 = arith.constant 0 : i32
    %c0_i32_1 = arith.constant 0 : i32
    return %c0_i32, %c0_i32_0 : i32, i32
  }
  func.func @transform_3(%arg0: i32, %arg1: i32) -> (i32, i32) {
    %c0_i32 = arith.constant 0 : i32
    %c0_i32_0 = arith.constant 0 : i32
    %c0_i32_1 = arith.constant 0 : i32
    return %c0_i32, %c0_i32_0 : i32, i32
  }
  func.func @transform_4(%arg0: i32, %arg1: i32) -> (i32, i32) {
    %c0_i32 = arith.constant 0 : i32
    %c0_i32_0 = arith.constant 0 : i32
    %c0_i32_1 = arith.constant 0 : i32
    return %c0_i32, %c0_i32_0 : i32, i32
  }
  func.func @transform_5(%arg0: i32, %arg1: i32) -> (i32, i32) {
    %c0_i32 = arith.constant 0 : i32
    %c0_i32_0 = arith.constant 0 : i32
    %c0_i32_1 = arith.constant 0 : i32
    return %c0_i32, %c0_i32_0 : i32, i32
  }
  func.func @transform_6(%arg0: i32, %arg1: i32) -> (i32, i32, i32, i32) {
    %c0_i32 = arith.constant 0 : i32
    %c0_i32_0 = arith.constant 0 : i32
    %c0_i32_1 = arith.constant 0 : i32
    return %arg0, %c0_i32, %arg1, %c0_i32_0 : i32, i32, i32, i32
  }
}

</mosaic_0001>

<bundles_post_ra>
// kernel: tpu_custom_call.1
= control target key start
LH: loop header
LB: loop body
LE: loop exit
PB: predicated region body
PF: predicated region fallthrough
CT: control target
= control target key end

     0   :  { %11 = vsyncpa [#allocation3], 0  ;;  %s1798_s0 = inlined_call_operand.vmem [shape: f32[2,8,4,256], index: 0, kind: input, shape index: {}]   ;;  %s1799_s1 = inlined_call_operand.vmem [shape: f32[256,16], index: 1, kind: input, shape index: {}]   ;;  %s1800_s2 = inlined_call_operand.vmem [shape: f32[16,16], index: 2, kind: input, shape index: {}]   ;;  %s1801_s3 = inlined_call_operand.vmem [shape: f32[1,16], index: 3, kind: input, shape index: {}]   ;;  %s1802_s4 = inlined_call_operand.vmem [shape: f32[16,16], index: 4, kind: input, shape index: {}]   ;;  %s1803_s5 = inlined_call_operand.vmem [shape: f32[1,16], index: 5, kind: input, shape index: {}]   ;;  %s1804_s6 = inlined_call_operand.hbm [shape: f32[2,8,4,256], index: 6, kind: output, shape index: {}]  }
   0x1   :  { %13 = vsyncpa [#allocation3 + $0x1], 0  ;;  %s1488_s21 = smov 0   ;;  %s1490_s22 = smov 0  }
   0x2   :  { %s1492_s23 = smov 0   ;;  %s1494_s24 = smov 0  }
   0x3   :  { %s1496_s25 = smov 0   ;;  %s1498_s26 = smov 0  }
   0x4 LB: > { %s1088_s27 = sadd.s32 4294967295, %s1447_s26   ;;  %s1089_s28 = sadd.s32 4294967294, %s1447_s26   ;;  %s1447_s26 = sphi %s1498_s26, %s19_s26   ;;  %s1443_s25 = sphi %s1496_s25, %s1811_s25   ;;  %s1439_s24 = sphi %s1494_s24, %s1810_s24   ;;  %s1435_s23 = sphi %s1492_s23, %s1809_s23   ;;  %s1431_s22 = sphi %s1490_s22, %s1808_s22   ;;  %s1427_s21 = sphi %s1488_s21, %s1807_s21  }
   0x5   : > { %s31_s29 = sadd.s32 1, %s1443_s25  ;;  %s173_s30 = sadd.s32 1, %s1435_s23 }
   0x6   : > { %p33_p0 = scmp.ge.s32.totalorder %s31_s29, 2  ;;  %p183_p1 = scmp.ne.s32.totalorder %s1435_s23, %s1431_s22 }
   0x7   : > { %p184_p2 = scmp.eq.s32.totalorder %s1088_s27, 1  ;;  %p189_p3 = scmp.ne.s32.totalorder %s1431_s22, %s1427_s21 }
   0x8   : > { %s1813_s29 = smov (%p33_p0, %s31_s29), 0  ;;  %p190_p5 = scmp.eq.s32.totalorder %s1089_s28, 1 }
   0x9   : > { %p1528_p4 = por %p184_p2, %p183_p1  ;;  %s168_s8 = ssub.s32 %s1443_s25, %s1813_s29 }
   0xa   : > { %p1092_p6 = scmp.ge.s32.totalorder %s1447_s26, 1  ;;  %p171_p7 = scmp.eq.s32.totalorder %s168_s8, 0 }
   0xb   : > { %p1535_p8 = por %p190_p5, %p189_p3  ;;  %p235_p9 = scmp.lt.s32.totalorder %s1447_s26, 3 }
   0xc   : > { %s1541_s10 = scalar_select %p171_p7, %s1435_s23, %s173_s30  }
   0xd   : > { %p236_p10 = pnand %p1092_p6, %p235_p9 }
   0xe   : > { %v302_v0 = vld [vmem:[%s1799_s1 + $0x80] sm:$0xff] (!%p236_p10)  ;;  %v303_v1 = vld [vmem:[%s1799_s1 + $0x88] sm:$0xff] (!%p236_p10)  ;;  %p269_p11 = scmp.lt.s32.totalorder (!%p236_p10), %s1439_s24, 1  ;;  %v304_v5 = vld [vmem:[%s1799_s1 + $0x90] sm:$0xff] (!%p236_p10)  ;;  %vm436_vm0 = vcmask (!%p236_p10), 130048   ;;  %vm812_vm3 = vcmask (!%p236_p10), 261120  }
   0xf   : > { %239 = sbr.rel (%p236_p10) target bundleno = 1283 (0x503), region = 44  ;;  %v286_v2 = vld [vmem:[%s1799_s1] sm:$0xff] (!%p236_p10)  ;;  %v1223_v3 = vpack.c.bf16 (!%p236_p10), %v303_v1, %v302_v0  ;;  %v287_v4 = vld [vmem:[%s1799_s1 + $0x8] sm:$0xff] (!%p236_p10)  ;;  %v305_v6 = vld [vmem:[%s1799_s1 + $0x98] sm:$0xff] (!%p236_p10)  ;;  %s266_s8 = sand.u32 (!%p236_p10), 1, %s1431_s22  }
  0x10   : > { %v1225_v7 = vpack.c.bf16 (!%p236_p10), %v287_v4, %v286_v2  ;;  %v1227_v8 = vpack.c.bf16 (!%p236_p10), %v305_v6, %v304_v5  ;;  %v288_v9 = vld [vmem:[%s1799_s1 + $0x10] sm:$0xff] (!%p236_p10)  ;;  %v289_v10 = vld [vmem:[%s1799_s1 + $0x18] sm:$0xff] (!%p236_p10)  ;;  %v306_v11 = vld [vmem:[%s1799_s1 + $0xa0] sm:$0xff] (!%p236_p10)  ;;  %s1093_s11 = sshll.u32 (!%p236_p10), %s266_s8, 6  ;;  %s1450_s19 = smov (!%p236_p10), [#allocation2]  }
  0x11   : > { %1224 = vmatprep.subr.bf16.mxu0 (!%p236_p10), %v1223_v3  ;;  %v307_v12 = vld [vmem:[%s1799_s1 + $0xa8] sm:$0xff] (!%p236_p10)  ;;  %v1229_v13 = vpack.c.bf16 (!%p236_p10), %v289_v10, %v288_v9  ;;  %v290_v15 = vld [vmem:[%s1799_s1 + $0x20] sm:$0xff] (!%p236_p10)  ;;  %v308_v17 = vld [vmem:[%s1799_s1 + $0xb0] sm:$0xff] (!%p236_p10)  ;;  %s268_s13 = scalar_lea.vmem (!%p236_p10), [#allocation2], %s1093_s11  ;;  %s1373_s27 = sshll.u32 (!%p236_p10), %s1450_s19, 4  ;;  %s1374_s27 = int_to_ptr.vmem [resolvable:$false] %s1373_s27 }
  0x12   : > { %1226 = vmatpush3.bf16.msra.mxu0 (!%p236_p10), %v1225_v7  ;;  %v1231_v14 = vpack.c.bf16 (!%p236_p10), %v307_v12, %v306_v11  ;;  %v291_v16 = vld [vmem:[%s1799_s1 + $0x28] sm:$0xff] (!%p236_p10)  ;;  %v309_v18 = vld [vmem:[%s1799_s1 + $0xb8] sm:$0xff] (!%p236_p10)  ;;  %v292_v21 = vld [vmem:[%s1799_s1 + $0x30] sm:$0xff] (!%p236_p10)  ;;  %s1006_s14 = sshll.u32 (!%p236_p10), %s268_s13, 4  ;;  %s1375_s28 = scalar_lea.vmem (!%p236_p10), %s1374_s27, 2048  ;;  %s1748_s14 = int_to_ptr.vmem [resolvable:$true] %s1006_s14 }
  0x13   : > { %1228 = vmatprep.subr.bf16.mxu0 (!%p236_p10), %v1227_v8  ;;  %v1233_v19 = vpack.c.bf16 (!%p236_p10), %v291_v16, %v290_v15  ;;  %v1235_v20 = vpack.c.bf16 (!%p236_p10), %v309_v18, %v308_v17  ;;  %v293_v22 = vld [vmem:[%s1799_s1 + $0x38] sm:$0xff] (!%p236_p10)  ;;  %v310_v23 = vld [vmem:[%s1799_s1 + $0xc0] sm:$0xff] (!%p236_p10)  ;;  %v311_v24 = vld [vmem:[%s1799_s1 + $0xc8] sm:$0xff] (!%p236_p10)  ;;  %s1369_s18 = scalar_lea.vmem (!%p236_p10), %s1748_s14, 1024  ;;  %p1376_p1 = scmp.lt.s32.totalorder (!%p236_p10), %s1748_s14, %s1374_s27 }
  0x14   : > { %v294_v25 = vld [vmem:[%s1799_s1 + $0x40] sm:$0xff] (!%p236_p10)  ;;  %v295_v26 = vld [vmem:[%s1799_s1 + $0x48] sm:$0xff] (!%p236_p10)  ;;  %v1237_v27 = vpack.c.bf16 (!%p236_p10), %v293_v22, %v292_v21  ;;  %v1239_v31 = vpack.c.bf16 (!%p236_p10), %v311_v24, %v310_v23  ;;  %v312_v33 = vld [vmem:[%s1799_s1 + $0xd0] sm:$0xff] (!%p236_p10)  ;;  %p1370_p12 = scmp.ne.s32.totalorder (!%p236_p10), %s1748_s14, %s1369_s18  ;;  %p1377_p2 = scmp.lt.s32.totalorder (!%p236_p10), %s1375_s28, %s1369_s18 }
  0x15   : > { %v313_v34 = vld [vmem:[%s1799_s1 + $0xd8] sm:$0xff] (!%p236_p10)  ;;  %v1241_v39 = vpack.c.bf16 (!%p236_p10), %v295_v26, %v294_v25  ;;  %v296_v41 = vld [vmem:[%s1799_s1 + $0x50] sm:$0xff] (!%p236_p10)  ;;  %v314_v44 = vld [vmem:[%s1799_s1 + $0xe0] sm:$0xff] (!%p236_p10) }
  0x16   : > { %s270_s15 = scalar_select %p269_p11, %s1439_s24, 1  ;;  %1230 = vmatpush3.bf16.msra.mxu0 %v1229_v13  ;;  %v1243_v40 = vpack.c.bf16 %v313_v34, %v312_v33  ;;  %v297_v42 = vld [vmem:[%s1799_s1 + $0x58] sm:$0xff]  ;;  %v315_v45 = vld [vmem:[%s1799_s1 + $0xe8] sm:$0xff]  ;;  %v298_v48 = vld [vmem:[%s1799_s1 + $0x60] sm:$0xff] }
  0x17   : > { %1232 = vmatprep.subr.bf16.mxu0 %v1231_v14  ;;  %v1245_v46 = vpack.c.bf16 %v297_v42, %v296_v41  ;;  %v1247_v47 = vpack.c.bf16 %v315_v45, %v314_v44  ;;  %v299_v49 = vld [vmem:[%s1799_s1 + $0x68] sm:$0xff]  ;;  %v316_v50 = vld [vmem:[%s1799_s1 + $0xf0] sm:$0xff]  ;;  %v317_v51 = vld [vmem:[%s1799_s1 + $0xf8] sm:$0xff]  ;;  %v737_v41 = vlaneseq  ;;  %p1371_p13 = pnand %p1370_p12, %p1528_p4  ;;  %p1378_p3 = por %p1377_p2, %p1376_p1 }
  0x18   : > { %s1123_s12 = sshll.u32 %s270_s15, 6  ;;  %v1249_v52 = vpack.c.bf16 %v299_v49, %v298_v48  ;;  %v1251_v53 = vpack.c.bf16 %v317_v51, %v316_v50  ;;  %v300_v54 = vld [vmem:[%s1799_s1 + $0x70] sm:$0xff]  ;;  %v301_v55 = vld [vmem:[%s1799_s1 + $0x78] sm:$0xff]  ;;  %v427_v59 = vld [vmem:[%s1800_s2] sm:$0xff] }
  0x19   : > { %s1596_s20 = scalar_lea.vmem %s1798_s0, %s1123_s12  ;;  %v1253_v56 = vpack.c.bf16 %v301_v55, %v300_v54  ;;  %v428_v60 = vld [vmem:[%s1800_s2 + $0x8] sm:$0xff]  ;;  %v534_v62 = vld [vmem:[%s1802_s4] sm:$0xff]  ;;  %vm1264_vm1 = vmpackc.low %vm436_vm0, %vm436_vm0  ;;  %v738_v42 = vshrl.u32 %v737_v41, 7  ;;  %v791_v44 = vand.u32 127, %v737_v41  ;;  %s1124_s12 = sshll.u32 %s1439_s24, 10 }
  0x1a   : > { %1234 = vmatpush3.bf16.msra.mxu0 %v1233_v19  ;;  %v1611_v28 = vld [vmem:[%s1596_s20] ss:$8 sps:$4 sm:$0xff]   ;;  %v1614_v29 = vld [vmem:[%s1596_s20 + $0x4] ss:$8 sps:$4 sm:$0xff]   ;;  %v1617_v30 = vld [vmem:[%s1596_s20 + $0x14] ss:$8 sps:$4 sm:$0xff]   ;;  %v1255_v61 = vpack.c.bf16 %v428_v60, %v427_v59  ;;  %p1372_p0 = pneg %p1371_p13 }
  0x1b   : > { %1236 = vmatprep.subr.bf16.mxu0 %v1235_v20  ;;  %v1620_v32 = vld [vmem:[%s1596_s20 + $0x10] ss:$8 sps:$4 sm:$0xff]   ;;  %406 = vmatprep.mubr.f32.mxu0 %v1614_v29  ;;  %v1275_v35 = vpack.c.bf16 %v1617_v30, %v1614_v29  ;;  %v1634_v37 = vld [vmem:[%s1596_s20 + $0x20] ss:$8 sps:$4 sm:$0xff]   ;;  %v1674_v57 = vld [vmem:[%s1596_s20 + $0x24] ss:$8 sps:$4 sm:$0xff]  }
  0x1c   : > { %v1277_v36 = vpack.c.bf16 %v1620_v32, %v1611_v28  ;;  %v1637_v38 = vld [vmem:[%s1596_s20 + $0x30] ss:$8 sps:$4 sm:$0xff]   ;;  %v1679_v58 = vld [vmem:[%s1596_s20 + $0x34] ss:$8 sps:$4 sm:$0xff]   ;;  %1256 = vmatprep.subr.bf16.mxu1 %v1255_v61  ;;  %v535_v63 = vld [vmem:[%s1802_s4 + $0x8] sm:$0xff]  ;;  %v739_v45 = vadd.s32 8, %v738_v42  ;;  %s1746_s20 = scalar_lea.hbm %s1804_s6, %s1124_s12  ;;  %p1379_p5 = pnand %p1378_p3, %p1372_p0 }
  0x1d   : > { %v1281_v43 = vpack.c.bf16 %v1637_v38, %v1634_v37  ;;  %1258 = vmatpush3.bf16.msra.mxu1 %v1255_v61  ;;  %v1259_v0 = vpack.c.bf16 %v535_v63, %v534_v62  ;;  %v1096_v13 = vld [vmem:[%s1801_s3] ss:$0 sm:$0xff]  ;;  %v746_v29 = vand.u32 3, %v738_v42  ;;  %s1752_s24 = scalar_lea.sflag [#allocation3], %s266_s8 }
  0x1e   : > { %1238 = vmatpush3.bf16.msra.mxu0 %v1237_v27  ;;  %v1101_v19 = vld [vmem:[%s1803_s5] ss:$0 sm:$0xff] }
  0x1f   : > { %1240 = vmatprep.subr.bf16.mxu0 %v1239_v31  ;;  %1260 = vmatprep.subr.bf16.mxu1 %v1259_v0 }
  0x22   : > { %1242 = vmatpush3.bf16.msra.mxu0 %v1241_v39 }
  0x23   : > { %1244 = vmatprep.subr.bf16.mxu0 %v1243_v40 }
  0x26   : > { %1246 = vmatpush3.bf16.msra.mxu0 %v1245_v46  ;;  %v796_v46 = vand.u32 3, %v791_v44 }
  0x27   : > { %1248 = vmatprep.subr.bf16.mxu0 %v1247_v47  ;;  %v741_v47 = vadd.s32 24, %v738_v42 }
  0x28   : > { %vm804_vm2 = vcmp.eq.s32.totalorder %v746_v29, %v796_v46 }
  0x2a   : > { %1250 = vmatpush3.bf16.msra.mxu0 %v1249_v52 }
  0x2b   : > { %1252 = vmatprep.subr.bf16.mxu0 %v1251_v53 }
  0x2e   : > { %1254 = vmatpush3.bf16.msra.mxu0 %v1253_v56 }
  0x31   : > { %407 = vmatmul.mubr.f32.vlgmr.msra.gmra.mrb[0].mxu0 %v1611_v28  ;;  %v767_v28 = vand.u32 3, %v741_v47 }
  0x32   : > { %411 = vmatprep.mubr.f32.mxu0 %v1617_v30  ;;  %v740_v30 = vadd.s32 16, %v738_v42 }
  0x33   : > { %vm807_vm6 = vcmp.eq.s32.totalorder %v767_v28, %v796_v46 }
  0x34   : > { %v760_v48 = vand.u32 3, %v740_v30 }
  0x35   : > { %412 = vmatmul.mubr.f32.gmra.mrb[2].mxu0 %v1620_v32 }
  0x36   : > { %416 = vmatprep.mubr.f32.mxu0 %v1674_v57  ;;  %vm806_vm5 = vcmp.eq.s32.totalorder %v760_v48, %v796_v46 }
  0x39   : > { %417 = vmatmul.mubr.f32.gmra.mrb[4].mxu0 %v1634_v37 }
  0x3a   : > { %421 = vmatprep.mubr.f32.mxu0 %v1679_v58 }
  0x3d   : > { %422 = vmatmul.mubr.f32.gmra.mrb[6].mxu0 %v1637_v38 }
 0x104   : > { %v1157_v1 = vpop.f32.mrb[0].mxu0 }
 0x105   : > { %v1158_v2 = vpop.f32.mrb[1].mxu0 }
 0x106   : > { %v1159_v3 = vadd.f32 %v1158_v2, %v1157_v1 }
 0x108   : > { %v1160_v4 = vpop.f32.mrb[2].mxu0  ;;  %1193 = vmatprep.mubr.msk.f32.mxu1 %vm436_vm0, %v1159_v3 }
 0x109   : > { %v1161_v5 = vpop.f32.mrb[3].mxu0 }
 0x10a   : > { %v1162_v6 = vadd.f32 %v1161_v5, %v1160_v4 }
 0x10c   : > { %v1163_v7 = vpop.f32.mrb[4].mxu0  ;;  %1194 = vmatmul.mubr.msk.f32.vlgmr.msra.gmra.mrb[0].mxu1 %vm436_vm0, %v1162_v6 }
 0x10d   : > { %v1164_v8 = vpop.f32.mrb[5].mxu0  ;;  %1262 = vmatpush3.bf16.msra.mxu1 %v1259_v0 }
 0x10e   : > { %v1165_v9 = vadd.f32 %v1164_v8, %v1163_v7 }
 0x110   : > { %v1166_v10 = vpop.f32.mrb[6].mxu0  ;;  %1196 = vmatprep.mubr.msk.f32.mxu1 %vm436_vm0, %v1165_v9 }
 0x111   : > { %v1167_v11 = vpop.f32.mrb[7].mxu0 }
 0x112   : > { %v1168_v12 = vadd.f32 %v1167_v11, %v1166_v10 }
 0x114   : > { %1197 = vmatmul.mubr.msk.f32.gmra.mrb[2].mxu1 %vm436_vm0, %v1168_v12 }
 0x115   : > { %1203 = vmatprep.mubr.msk.f32.mxu1 %vm436_vm0, %v1159_v3 }
 0x118   : > { %1204 = vmatmul.mubr.msk.f32.vlgmr.msra.gmra.mrb[4].mxu1 %vm436_vm0, %v1162_v6 }
 0x119   : > { %1206 = vmatprep.mubr.msk.f32.mxu1 %vm436_vm0, %v1165_v9 }
 0x11c   : > { %1207 = vmatmul.mubr.msk.f32.gmra.mrb[6].mxu1 %vm436_vm0, %v1168_v12 }
 0x1df   : > { %v1195_v14 = vpop.f32.mrb[0].mxu1 }
 0x1e0   : > { %v515_v15 = vpop.f32.mrb[1].mxu1  ;;  %v521_v34 = vadd.f32 %v1195_v14, %v1096_v13 }
 0x1e1   : > { %v516_v16 = vadd.f32 %v1096_v13, %v515_v15 }
 0x1e3   : > { %1217 = vmatprep.mubr.msk.f32.mxu1 %vm436_vm0, %v516_v16 }
 0x1e7   : > { %v1198_v17 = vpop.f32.mrb[2].mxu1 }
 0x1e8   : > { %v525_v18 = vpop.f32.mrb[3].mxu1  ;;  %v531_v40 = vadd.f32 %v1198_v17, %v1096_v13  ;;  %v1279_v17 = vpack.c.bf16 %v1679_v58, %v1674_v57 }
 0x1e9   : > { %v526_v39 = vadd.f32 %v1096_v13, %v525_v18  ;;  %v1449_v18 = vmov 0.0  }
 0x1eb   : > { %v1205_v20 = vpop.f32.mrb[4].mxu1 }
 0x1ec   : > { %v615_v21 = vadd.f32 %v1205_v20, %v1101_v19  ;;  %v609_v22 = vpop.f32.mrb[5].mxu1 }
 0x1ed   : > { %v610_v23 = vadd.f32 %v1101_v19, %v609_v22 }
 0x1ef   : > { %v1263_v24 = vpack.c.bf16 %v615_v21, %v610_v23  ;;  %v1208_v25 = vpop.f32.mrb[6].mxu1 }
 0x1f0   : > { %v625_v26 = vadd.f32 %v1208_v25, %v1101_v19  ;;  %v619_v27 = vpop.f32.mrb[7].mxu1 }
 0x1f1   : > { %v620_v31 = vadd.f32 %v1101_v19, %v619_v27  ;;  %1265 = vmatprep.subr.msk.bf16.mxu1 %vm1264_vm1, %v1263_v24 }
 0x1f2   : > { %1268 = vmatpush3.bf16.xpose.msk.msra.mxu1 %vm1264_vm1, %v1263_v24 }
 0x1f3   : > { %v1269_v33 = vpack.c.bf16 %v625_v26, %v620_v31 }
 0x1f5   : > { %1271 = vmatprep.subr.msk.bf16.mxu1 %vm1264_vm1, %v1269_v33 }
 0x1fa   : > { %1274 = vmatpush3.bf16.xpose.msk.msra.mxu1 %vm1264_vm1, %v1269_v33 }
 0x1fb   : > { %1276 = vmatprep.subr.bf16.mxu1 %v1275_v35  ;;  %v753_v35 = vand.u32 3, %v739_v45 }
 0x1fd   : > { %vm805_vm4 = vcmp.eq.s32.totalorder %v753_v35, %v796_v46 }
 0x201   : > { %1218 = vmatmul.mubr.msk.f32.vlgmr.msra.gmra.mrb[8].mxu1 %vm436_vm0, %v521_v34 }
 0x202   : > { %1220 = vmatprep.mubr.msk.f32.mxu1 %vm436_vm0, %v526_v39  ;;  %1278 = vmatpush1.bf16.msra.mxu1 %v1277_v36 }
 0x203   : > { %1280 = vmatprep.subr.bf16.mxu1 %v1279_v17 }
 0x205   : > { %1221 = vmatmul.mubr.msk.f32.gmra.mrb[10].mxu1 %vm436_vm0, %v531_v40 }
 0x206   : > { %1282 = vmatpush1.bf16.msra.mxu1 %v1281_v43  ;;  %933 = vmatprep.mubr.f32.mxu1 %v1449_v18 }
 0x2d4   : > { %v1219_v49 = vpop.f32.mrb[8].mxu1 }
 0x2d5   : > { %v718_v50 = vpop.f32.mrb[9].mxu1  ;;  %v809_v51 = vsel %vm805_vm4, %v1219_v49, -1e+30 }
 0x2d6   : > { %v808_v32 = vsel %vm804_vm2, %v718_v50, -1e+30  ;;  %v816_v55 = vsel %vm812_vm3, %v809_v51, -inf }
 0x2d7   : > { %v813_v36 = vsel %vm812_vm3, %v808_v32, -inf }
 0x2d8   : > { %814 = vmax.xlane.f32.xlu0 %v813_v36  ;;  %v1222_v52 = vpop.f32.mrb[10].mxu1 }
 0x2d9   : > { %v728_v53 = vpop.f32.mrb[11].mxu1  ;;  %v811_v59 = vsel %vm807_vm6, %v1222_v52, -1e+30 }
 0x2da   : > { %v810_v54 = vsel %vm806_vm5, %v728_v53, -1e+30  ;;  %v822_v60 = vsel %vm812_vm3, %v811_v59, -inf }
 0x2db   : > { %v819_v56 = vsel %vm812_vm3, %v810_v54, -inf }
 0x2dc   : > { %817 = vmax.xlane.f32.xlu0 %v816_v55  ;;  %820 = vmax.xlane.f32.xlu1 %v819_v56 }
 0x2e0   : > { %823 = vmax.xlane.f32.xlu1 %v822_v60 }
 0x365   : > { %v815_v61 = vpop.xlane.xlu0 %814 }
 0x366   : > { %v825_v62 = vsub.f32 %v808_v32, %v815_v61 }
 0x368   : > { %v829_v63 = vmul.f32 1.442695, %v825_v62 }
 0x369   : > { %v818_v0 = vpop.xlane.xlu0 %817  ;;  %v821_v1 = vpop.xlane.xlu1 %820 }
 0x36a   : > { %1353 = vpow2.f32 %v829_v63  ;;  %v826_v2 = vsub.f32 %v809_v51, %v818_v0  ;;  %v827_v3 = vsub.f32 %v810_v54, %v821_v1 }
 0x36c   : > { %v831_v4 = vmul.f32 1.442695, %v826_v2  ;;  %v833_v5 = vmul.f32 1.442695, %v827_v3 }
 0x36d   : > { %v824_v6 = vpop.xlane.xlu1 %823 }
 0x36e   : > { %1355 = vpow2.f32 %v831_v4  ;;  %v828_v7 = vsub.f32 %v811_v59, %v824_v6 }
 0x36f   : > { %1357 = vpow2.f32 %v833_v5 }
 0x370   : > { %v835_v8 = vmul.f32 1.442695, %v828_v7 }
 0x372   : > { %1359 = vpow2.f32 %v835_v8 }
 0x374   : > { %v1354_v9 = vpop.eup %1353 }
 0x375   : > { %v837_v10 = vsel %vm812_vm3, %v1354_v9, 0.0 }
 0x376   : > { %838 = vadd.xlane.f32.xlu0 %v837_v10 }
 0x378   : > { %v1356_v11 = vpop.eup %1355 }
 0x379   : > { %v1358_v12 = vpop.eup %1357  ;;  %v840_v13 = vsel %vm812_vm3, %v1356_v11, 0.0 }
 0x37a   : > { %841 = vadd.xlane.f32.xlu1 %v840_v13  ;;  %v843_v14 = vsel %vm812_vm3, %v1358_v12, 0.0 }
 0x37b   : > { %844 = vadd.xlane.f32.xlu0 %v843_v14 }
 0x37c   : > { %v1360_v15 = vpop.eup %1359 }
 0x37d   : > { %v846_v16 = vsel %vm812_vm3, %v1360_v15, 0.0 }
 0x37e   : > { %847 = vadd.xlane.f32.xlu1 %v846_v16 }
 0x403   : > { %v839_v19 = vpop.xlane.xlu0 %838 }
 0x404   : > { %1361 = vrcp.f32 %v839_v19 }
 0x407   : > { %v842_v20 = vpop.xlane.xlu1 %841 }
 0x408   : > { %v845_v21 = vpop.xlane.xlu0 %844  ;;  %1363 = vrcp.f32 %v842_v20 }
 0x409   : > { %1365 = vrcp.f32 %v845_v21 }
 0x40b   : > { %v848_v22 = vpop.xlane.xlu1 %847 }
 0x40c   : > { %1367 = vrcp.f32 %v848_v22 }
 0x40e   : > { %v1362_v23 = vpop.eup %1361 }
 0x40f   : > { %v853_v24 = vmul.f32 %v1362_v23, %v1354_v9 }
 0x411   : > { %1114 = vmatmul.mubr.msk.f32.vlgmr.msra.gmra.mrb[12].mxu1 %vm812_vm3, %v853_v24 }
 0x412   : > { %v1364_v57 = vpop.eup %1363  ;;  %939 = vmatprep.mubr.f32.mxu1 %v1449_v18 }
 0x413   : > { %v854_v37 = vmul.f32 %v1364_v57, %v1356_v11  ;;  %v1366_v38 = vpop.eup %1365 }
 0x414   : > { %v855_v43 = vmul.f32 %v1366_v38, %v1358_v12 }
 0x415   : > { %1115 = vmatmul.mubr.msk.f32.gmra.mrb[14].mxu1 %vm812_vm3, %v854_v37 }
 0x416   : > { %945 = vmatprep.mubr.f32.mxu1 %v1449_v18  ;;  %v1368_v58 = vpop.eup %1367 }
 0x417   : > { %v856_v25 = vmul.f32 %v1368_v58, %v1360_v15 }
 0x419   : > { %1116 = vmatmul.mubr.msk.f32.gmra.mrb[16].mxu1 %vm812_vm3, %v855_v43 }
 0x41a   : > { %951 = vmatprep.mubr.f32.mxu1 %v1449_v18 }
 0x41d   : > { %1117 = vmatmul.mubr.msk.f32.gmra.mrb[18].mxu1 %vm812_vm3, %v856_v25 }
 0x4e4   : > { %v935_v26 = vpop.f32.mrb[12].mxu1 }
 0x4e5   : > { %v937_v27 = vpop.f32.mrb[13].mxu1 }
 0x4e6   : > { %v966_v31 = vcombine.low %v935_v26, %v937_v27  ;;  %v967_v33 = vcombine.high %v935_v26, %v937_v27 }
 0x4e8   : > { %982 = vst [vmem:[%s268_s13] sm:$0xff] %v966_v31  ;;  %983 = vst [vmem:[%s268_s13 + $0x8] sm:$0xff] %v967_v33  ;;  %v941_v34 = vpop.f32.mrb[14].mxu1 }
 0x4e9   : > { %v943_v39 = vpop.f32.mrb[15].mxu1 }
 0x4ea   : > { %v968_v40 = vcombine.low %v941_v34, %v943_v39  ;;  %v969_v41 = vcombine.high %v941_v34, %v943_v39 }
 0x4ec   : > { %984 = vst [vmem:[%s268_s13 + $0x10] sm:$0xff] %v968_v40  ;;  %985 = vst [vmem:[%s268_s13 + $0x18] sm:$0xff] %v969_v41  ;;  %v947_v42 = vpop.f32.mrb[16].mxu1 }
 0x4ed   : > { %v949_v44 = vpop.f32.mrb[17].mxu1 }
 0x4ee   : > { %v970_v45 = vcombine.low %v947_v42, %v949_v44  ;;  %v971_v46 = vcombine.high %v947_v42, %v949_v44 }
 0x4f0   : > { %986 = vst [vmem:[%s268_s13 + $0x20] sm:$0xff] %v970_v45  ;;  %987 = vst [vmem:[%s268_s13 + $0x28] sm:$0xff] %v971_v46  ;;  %v953_v29 = vpop.f32.mrb[18].mxu1 }
 0x4f1   : > { %v955_v30 = vpop.f32.mrb[19].mxu1 }
 0x4f2   : > { %v972_v35 = vcombine.low %v953_v29, %v955_v30  ;;  %v973_v47 = vcombine.high %v953_v29, %v955_v30 }
 0x4f4   : > { %988 = vst [vmem:[%s268_s13 + $0x30] sm:$0xff] %v972_v35  ;;  %989 = vst [vmem:[%s268_s13 + $0x38] sm:$0xff] %v973_v47 }
 0x4f5   : > { %1382 = shalt.err (!%p1379_p5)
}
 0x4f6   : > { %s1383_s15 = scalar_lea.hbm %s1746_s20, 1024  ;;  %s1387_s11 = scalar_lea.hbm %s1804_s6, 2048 }
 0x4f7   : > { %p1384_p6 = scmp.ne.s32.totalorder %s1746_s20, %s1383_s15  ;;  %p1388_p10 = scmp.lt.u32.totalorder %s1746_s20, %s1804_s6 }
 0x4f8   : > { %p1389_p11 = scmp.lt.u32.totalorder %s1387_s11, %s1383_s15  ;;  %p1391_p13 = scmp.lt.u32.totalorder %s1383_s15, %s1746_s20 }
 0x4f9   : > { %p1385_p7 = pnand %p1384_p6, %p1528_p4 }
 0x4fa   : > { %p1390_p12 = por %p1389_p11, %p1388_p10 }
 0x4fb   : > { %p1386_p9 = pneg %p1385_p7 }
 0x4fc   : > { %p1392_p0 = por %p1391_p13, %p1390_p12 }
 0x4fe   : > { %p1393_p1 = pnand %p1392_p0, %p1386_p9 }
 0x500   : > { %1396 = shalt.err (!%p1393_p1)
}
 0x501   : > { %s1451_s16 = smov 128   ;;  %s1452_s17 = smov 8  }
 0x502   : > { %1283 = dma.vmem_to_hbm [thread:$0]  (%p1528_p4), %s1748_s14, 1024, %s1746_s20, %s1752_s24, %s1451_s16, %s1451_s16, %s1452_s17  }
 0x503 PF: > { %p1289_p2 = scmp.ge.s32.totalorder %s1447_s26, 2  ;;  %s1021_s18 = sand.u32 1, %s1427_s21  }
 0x504   : > { %s1022_s19 = scalar_lea.sflag [#allocation3], %s1021_s18 }
 0x505   : > { %p1286_p3 = pnand %p1289_p2, %p1535_p8 }
 0x507   : > { %1422 = dma.done.wait (!%p1286_p3), %s1022_s19, 1024  }
 0x508   : > { %1424 = vsyncadd (!%p1286_p3), %s1022_s19, 4294966272  ;;  %s19_s26 = sadd.s32 1, %s1447_s26   ;;  %s1807_s21 = smov %s1431_s22 }
 0x509   : > { %p16_p5 = scmp.ge.s32.totalorder %s19_s26, 4   ;;  %s1808_s22 = smov %s1435_s23 }
 0x50a   : > { %s1809_s23 = smov %s1541_s10  ;;  %s1810_s24 = smov %s1443_s25 }
 0x50b   : > { %s1811_s25 = smov %s1813_s29  ;;  %18 = sbr.rel (!%p16_p5) target bundleno = 4 (0x4), region = 79 }
 0x512   :  { %1027 = vsyncpa [#allocation3], 1 }
 0x513   :  { %1029 = vsyncpa [#allocation3 + $0x1], 1 }

</bundles_post_ra>
